<compile_context>
chip_gen: v7x
topology: tpu7x:2x2x1
jax: 0.10.0
libtpu: 0.0.40
codegen_flags: <defaults>
</compile_context>

<pallas_src>
import functools

import jax
import jax.numpy as jnp
from jax.experimental import pallas as pl
from jax.experimental.pallas import tpu as pltpu


LANE = 128  # TPU lane width; every head group is padded to one 128-lane slot.


# ----------------------------------------------------------------------------
# Kernels
# ----------------------------------------------------------------------------
def _dueling_goal_kernel(x_ref, gpad_ref, wb_ref, bb_ref, wh_ref, bh_ref, q_ref,
                         *, goal_dim, action_dim, lane, mxu_dtype):
    """Branch where 'goal' is present.

    Packed layout of the fused head output `head` = phi @ wh + bh:
      head[:, 0:128]               -> value head   (first G lanes real)
      head[:, (1+g)*128:(2+g)*128] -> advantage group g (first A lanes real)
    q[b, a] = <goal[b], value[b]> + adv_g[b, a] - mean_a(adv_g[b, :A])
    Output is a lane-dense [TB, 128] slab (first A lanes real).
    """
    x = x_ref[...]                                                   # [TB, S]
    phi = jnp.maximum(
        jnp.dot(x, wb_ref[...], preferred_element_type=jnp.float32)
        + bb_ref[...], 0.0)                                          # [TB, F] f32

    # Single fused head matmul (bf16 operands on v6e/v7x, f32 accumulation).
    head = (jnp.dot(phi.astype(mxu_dtype), wh_ref[...],
                    preferred_element_type=jnp.float32)
            + bh_ref[...])                                           # [TB,(1+G)*128]

    gpad = gpad_ref[...]                                             # [TB, 128] f32

    # value contraction: goal (zero-padded to 128 lanes) . value-group lanes.
    v = jnp.sum(gpad * head[:, :lane], axis=-1, keepdims=True)       # [TB, 1]

    # advantage contraction, fused: broadcast goal lane g over group g's
    # aligned 128-lane slab and accumulate (no [TB, G*128] intermediate).
    adv = gpad[:, 0:1] * head[:, lane:2 * lane]                      # [TB, 128]
    for g in range(1, goal_dim):
        adv = adv + gpad[:, g:g + 1] * head[:, (1 + g) * lane:(2 + g) * lane]

    # Padded lanes of adv are exactly zero (zero weight/bias columns), so the
    # mean over the A real actions is sum / A.
    mean = jnp.sum(adv, axis=-1, keepdims=True) * (1.0 / action_dim)

    q_ref[...] = v + adv - mean                                      # one store


def _dueling_nogoal_kernel(x_ref, wb_ref, bb_ref, wh_ref, bh_ref, q_ref,
                           *, goal_dim, action_dim, lane, mxu_dtype):
    """Branch where 'goal' is absent.

    PyTorch produces q of shape (B*G, A).  Here row (b, g) lives in the
    aligned 128-lane group g of a [TB, G*128] slab; the wrapper slices back.
    Each group is stored directly into its aligned output slice (full-vreg,
    unmasked stores, no concatenate copy).
    """
    x = x_ref[...]
    phi = jnp.maximum(
        jnp.dot(x, wb_ref[...], preferred_element_type=jnp.float32)
        + bb_ref[...], 0.0)

    head = (jnp.dot(phi.astype(mxu_dtype), wh_ref[...],
                    preferred_element_type=jnp.float32)
            + bh_ref[...])                                           # [TB,(1+G)*128]

    value = head[:, :lane]                                           # [TB, 128]
    inv_a = 1.0 / action_dim
    for g in range(goal_dim):
        a_g = head[:, (g + 1) * lane:(g + 2) * lane]                 # aligned slab
        mean_g = jnp.sum(a_g, axis=-1, keepdims=True) * inv_a        # zeros inert
        q_ref[:, g * lane:(g + 1) * lane] = value[:, g:g + 1] + a_g - mean_g


# ----------------------------------------------------------------------------
# Wrapper helpers
# ----------------------------------------------------------------------------
def _round_up(n, m):
    return ((n + m - 1) // m) * m


def _batch_tiling(batch, *, per_row_bytes, resident_bytes, sublane):
    """Pick a batch tile that minimizes tail padding and fits VMEM.

    * TB is ~ceil(B / n_tiles) rounded up to the sublane (no flat 512 cap that
      could nearly double work for unlucky batch sizes).
    * TB is capped so the double-buffered working set stays ~<= 12 MiB: fits
      v5e's 16 MiB default scoped VMEM and leaves headroom on v7x's 64 MiB.
    * When the batch is large enough, at least 2 tiles are used so the
      "parallel" grid axis can shard across v7x's two TensorCores.
    """
    b_al = _round_up(batch, sublane)
    budget = max((12 << 20) - 2 * resident_bytes, 1 << 20)
    cap_rows = min(1024, budget // max(per_row_bytes, 1))
    cap_rows = max(sublane, (cap_rows // sublane) * sublane)
    n_tiles = pl.cdiv(b_al, cap_rows)
    if n_tiles < 2 and b_al >= 2 * sublane:
        n_tiles = 2
    tb = _round_up(pl.cdiv(b_al, n_tiles), sublane)
    bp = tb * pl.cdiv(b_al, tb)
    return tb, bp


def _pack_head_params(wv, bv, wa, ba, action_dim):
    """Pack value+advantage heads into one lane-padded weight/bias pair."""
    f, g = wv.shape
    a = action_dim
    wv_pad = jnp.zeros((f, LANE), jnp.float32).at[:, :g].set(wv)
    bv_pad = jnp.zeros((1, LANE), jnp.float32).at[:, :g].set(bv)
    wa_pad = (jnp.zeros((f, g, LANE), jnp.float32)
              .at[:, :, :a].set(wa.reshape(f, g, a))
              .reshape(f, g * LANE))
    ba_pad = (jnp.zeros((1, g, LANE), jnp.float32)
              .at[:, :, :a].set(ba.reshape(1, g, a))
              .reshape(1, g * LANE))
    wh = jnp.concatenate([wv_pad, wa_pad], axis=1)    # [F, (1+G)*128]
    bh = jnp.concatenate([bv_pad, ba_pad], axis=1)    # [1, (1+G)*128]
    return wh, bh


# ----------------------------------------------------------------------------
# Wrapper
# ----------------------------------------------------------------------------
def multi_head_dueling_forward(params, x, goal=None, *, mxu_dtype=jnp.float32):
    """Pallas implementation of MultiHeadDuelingNet.forward.

    params: wb [S,F], bb [1,F], wv [F,G], bv [1,G], wa [F,G*A], ba [1,G*A]
    x:      [B, state_dim] float32
    goal:   [B, goal_dim]  float32 or None
    mxu_dtype: dtype of MXU operands (jnp.float32 or jnp.bfloat16); the
      accumulation and all post-matmul math stay f32.
    """
    wb = params["wb"].astype(jnp.float32)
    bb = params["bb"].astype(jnp.float32)
    wv = params["wv"].astype(jnp.float32)
    bv = params["bv"].astype(jnp.float32)
    wa = params["wa"].astype(jnp.float32)
    ba = params["ba"].astype(jnp.float32)

    b, s = x.shape
    f = wb.shape[1]
    g = wv.shape[1]
    a = wa.shape[1] // g

    wh, bh = _pack_head_params(wv, bv, wa, ba, a)
    wb_m = wb.astype(mxu_dtype)
    wh_m = wh.astype(mxu_dtype)

    itemsize = jnp.dtype(mxu_dtype).itemsize
    sublane = 16 if itemsize < 4 else 8      # packed dtypes tile sublanes in pairs

    head_cols = (1 + g) * LANE
    out_w = LANE if goal is not None else g * LANE
    per_row_bytes = (2 * (s * itemsize + out_w * 4)
                     + (2 * LANE * 4 if goal is not None else 0))
    resident_bytes = ((s * f + f * head_cols) * itemsize
                      + (f + head_cols) * 4)

    tb, bp = _batch_tiling(b, per_row_bytes=per_row_bytes,
                           resident_bytes=resident_bytes, sublane=sublane)
    n_tiles = bp // tb

    x_m = x.astype(mxu_dtype)
    if bp == b:
        xp = x_m                              # no extra HBM read+write of x
    else:
        xp = jnp.zeros((bp, s), mxu_dtype).at[:b].set(x_m)

    def row_spec(width):                      # batch-blocked operand
        return pl.BlockSpec((tb, width), lambda i: (i, 0))

    def resident_spec(shape):                 # VMEM-resident weights / biases
        return pl.BlockSpec(shape, lambda i: (0, 0))

    cparams = pltpu.CompilerParams(dimension_semantics=("parallel",))

    flops = 2 * bp * (s * f + f * head_cols)
    weight_bytes = (s * f + f * head_cols) * itemsize + (f + head_cols) * 4
    out_bytes = bp * out_w * 4

    if goal is not None:
        goal = goal.astype(jnp.float32)
        # goal zero-padded to one full 128-lane slot (tiny stream: 128 f32/row).
        gpad = jnp.zeros((bp, LANE), jnp.float32).at[:b, :g].set(goal)

        cost = pl.CostEstimate(
            flops=flops, transcendentals=0,
            bytes_accessed=bp * s * itemsize + bp * LANE * 4
                           + weight_bytes + out_bytes)
        kernel = functools.partial(_dueling_goal_kernel, goal_dim=g,
                                   action_dim=a, lane=LANE, mxu_dtype=mxu_dtype)
        q_pad = pl.pallas_call(
            kernel,
            grid=(n_tiles,),
            in_specs=[row_spec(s),                 # x
                      row_spec(LANE),              # goal (lane-padded)
                      resident_spec(wb_m.shape),
                      resident_spec(bb.shape),
                      resident_spec(wh_m.shape),
                      resident_spec(bh.shape)],
            out_specs=row_spec(LANE),
            out_shape=jax.ShapeDtypeStruct((bp, LANE), jnp.float32),
            compiler_params=cparams,
            cost_estimate=cost,
        )(xp, gpad, wb_m, bb, wh_m, bh)
        return dict(q=q_pad[:b, :a])
    else:
        cost = pl.CostEstimate(
            flops=flops, transcendentals=0,
            bytes_accessed=bp * s * itemsize + weight_bytes + out_bytes)
        kernel = functools.partial(_dueling_nogoal_kernel, goal_dim=g,
                                   action_dim=a, lane=LANE, mxu_dtype=mxu_dtype)
        q_pad = pl.pallas_call(
            kernel,
            grid=(n_tiles,),
            in_specs=[row_spec(s),
                      resident_spec(wb_m.shape),
                      resident_spec(bb.shape),
                      resident_spec(wh_m.shape),
                      resident_spec(bh.shape)],
            out_specs=row_spec(g * LANE),
            out_shape=jax.ShapeDtypeStruct((bp, g * LANE), jnp.float32),
            compiler_params=cparams,
            cost_estimate=cost,
        )(xp, wb_m, bb, wh_m, bh)
        # Undo the lane padding and reproduce PyTorch's view(-1, A) semantics.
        q = q_pad[:b].reshape(b, g, LANE)[:, :, :a].reshape(b * g, a)
        return dict(q=q)


# ----------------------------------------------------------------------------
# Pure-JAX reference (mirrors the PyTorch forward; same MXU-operand casts as
# the kernel so the bf16 path can be checked tightly)
# ----------------------------------------------------------------------------
def reference_forward(params, x, goal=None, mxu_dtype=jnp.float32):
    f32 = jnp.float32
    wb = params["wb"].astype(f32).astype(mxu_dtype)
    phi = jnp.maximum(
        jnp.dot(x.astype(mxu_dtype), wb, preferred_element_type=f32)
        + params["bb"].astype(f32), 0.0)
    phi_m = phi.astype(mxu_dtype)
    value = (jnp.dot(phi_m, params["wv"].astype(f32).astype(mxu_dtype),
                     preferred_element_type=f32) + params["bv"].astype(f32))
    adv = (jnp.dot(phi_m, params["wa"].astype(f32).astype(mxu_dtype),
                   preferred_element_type=f32) + params["ba"].astype(f32))
    b = x.shape[0]
    g = value.shape[1]
    a = adv.shape[1] // g
    if goal is not None:
        v = jnp.einsum("bg,bg->b", goal, value)[:, None]               # [B,1]
        adv_g = jnp.einsum("bg,bga->ba", goal, adv.reshape(b, g, a))   # [B,A]
        q = v + adv_g - jnp.mean(adv_g, axis=1, keepdims=True)
        return dict(q=q)
    else:
        v = value.reshape(-1, 1)
        av = adv.reshape(-1, a)
        q = v + av - jnp.mean(av, axis=1, keepdims=True)
        return dict(q=q)


# ----------------------------------------------------------------------------
# Main
# ----------------------------------------------------------------------------
if __name__ == "__main__":
    B = 8             # batch
    state_dim = 32    # body input dim
    feature_dim = 64  # body.feature_dim
    goal_dim = 4
    action_dim = 6

    key = jax.random.PRNGKey(0)
    ks = jax.random.split(key, 8)

    params = dict(
        wb=jax.random.normal(ks[0], (state_dim, feature_dim), jnp.float32) * 0.1,
        bb=jnp.zeros((1, feature_dim), jnp.float32),
        wv=jax.random.normal(ks[1], (feature_dim, goal_dim), jnp.float32) * 1e-3,
        bv=jnp.zeros((1, goal_dim), jnp.float32),
        wa=jax.random.normal(ks[2], (feature_dim, goal_dim * action_dim),
                             jnp.float32) * 1e-3,
        ba=jnp.zeros((1, goal_dim * action_dim), jnp.float32),
    )

    x = jax.random.normal(ks[3], (B, state_dim), jnp.float32)
    goal = jax.random.normal(ks[4], (B, goal_dim), jnp.float32)

    # --- f32 MXU path (tight check) -----------------------------------------
    q_goal = jax.block_until_ready(multi_head_dueling_forward(params, x, goal)["q"])
    q_nogoal = jax.block_until_ready(multi_head_dueling_forward(params, x, None)["q"])
    q_goal_ref = reference_forward(params, x, goal)["q"]
    q_nogoal_ref = reference_forward(params, x, None)["q"]

    assert q_goal.shape == (B, action_dim)
    assert q_nogoal.shape == (B * goal_dim, action_dim)
    assert jnp.allclose(q_goal, q_goal_ref, atol=1e-5, rtol=1e-5)
    assert jnp.allclose(q_nogoal, q_nogoal_ref, atol=1e-5, rtol=1e-5)

    # --- bf16 MXU operands (v6e/v7x fast path), f32 accumulation ------------
    q_goal_bf = jax.block_until_ready(
        multi_head_dueling_forward(params, x, goal, mxu_dtype=jnp.bfloat16)["q"])
    q_nogoal_bf = jax.block_until_ready(
        multi_head_dueling_forward(params, x, None, mxu_dtype=jnp.bfloat16)["q"])
    q_goal_bf_ref = reference_forward(params, x, goal, mxu_dtype=jnp.bfloat16)["q"]
    q_nogoal_bf_ref = reference_forward(params, x, None, mxu_dtype=jnp.bfloat16)["q"]

    assert jnp.allclose(q_goal_bf, q_goal_bf_ref, atol=1e-4, rtol=1e-2)
    assert jnp.allclose(q_nogoal_bf, q_nogoal_bf_ref, atol=1e-4, rtol=1e-2)

    print("KERNEL_OK")
</pallas_src>

<mosaic_0001>
module attributes {stable_mosaic.version = 11 : i64} {
  func.func @_dueling_goal_kernel(%arg0: i32, %arg1: memref<8x32xf32, #tpu.memory_space<vmem>>, %arg2: memref<8x128xf32, #tpu.memory_space<vmem>>, %arg3: memref<32x64xf32, #tpu.memory_space<vmem>>, %arg4: memref<1x64xf32, #tpu.memory_space<vmem>>, %arg5: memref<64x640xf32, #tpu.memory_space<vmem>>, %arg6: memref<1x640xf32, #tpu.memory_space<vmem>>, %arg7: memref<8x128xf32, #tpu.memory_space<vmem>>) attributes {dimension_semantics = [#tpu.dimension_semantics<parallel>], iteration_bounds = array<i64: 1>, scalar_prefetch = 0 : i64, scratch_operands = 0 : i64, tpu.core_type = #tpu.core_type<tc>, window_params = [{transform_indices = @transform_0, window_bounds = array<i64: 8, 32>}, {transform_indices = @transform_1, window_bounds = array<i64: 8, 128>}, {pipeline_mode = #tpu.pipeline_mode<synchronous>, transform_indices = @transform_2, window_bounds = array<i64: 32, 64>}, {pipeline_mode = #tpu.pipeline_mode<synchronous>, transform_indices = @transform_3, window_bounds = array<i64: 1, 64>}, {pipeline_mode = #tpu.pipeline_mode<synchronous>, transform_indices = @transform_4, window_bounds = array<i64: 64, 640>}, {pipeline_mode = #tpu.pipeline_mode<synchronous>, transform_indices = @transform_5, window_bounds = array<i64: 1, 640>}, {transform_indices = @transform_6, window_bounds = array<i64: 8, 128>}]} {
    %c0 = arith.constant 0 : index
    %c0_0 = arith.constant 0 : index
    %0 = vector.load %arg1[%c0, %c0_0] : memref<8x32xf32, #tpu.memory_space<vmem>>, vector<8x32xf32>
    %c0_1 = arith.constant 0 : index
    %c0_2 = arith.constant 0 : index
    %1 = vector.load %arg3[%c0_1, %c0_2] : memref<32x64xf32, #tpu.memory_space<vmem>>, vector<32x64xf32>
    %cst = arith.constant dense<0.000000e+00> : vector<8x64xf32>
    %2 = tpu.matmul %0, %1, %cst {dimension_numbers = #tpu.dot_dimension_numbers<[1], [0], [0], [1], [0, 0, 1, 1], [], []>} : vector<8x32xf32>, vector<32x64xf32>, vector<8x64xf32> -> vector<8x64xf32>
    %c0_3 = arith.constant 0 : index
    %c0_4 = arith.constant 0 : index
    %3 = vector.load %arg4[%c0_3, %c0_4] : memref<1x64xf32, #tpu.memory_space<vmem>>, vector<1x64xf32>
    %4 = vector.broadcast %3 : vector<1x64xf32> to vector<8x64xf32>
    %5 = arith.addf %2, %4 : vector<8x64xf32>
    %cst_5 = arith.constant 0.000000e+00 : f32
    %6 = vector.broadcast %cst_5 : f32 to vector<8x64xf32>
    %7 = arith.maximumf %5, %6 : vector<8x64xf32>
    %c0_6 = arith.constant 0 : index
    %c0_7 = arith.constant 0 : index
    %8 = vector.load %arg5[%c0_6, %c0_7] : memref<64x640xf32, #tpu.memory_space<vmem>>, vector<64x640xf32>
    %cst_8 = arith.constant dense<0.000000e+00> : vector<8x640xf32>
    %9 = tpu.matmul %7, %8, %cst_8 {dimension_numbers = #tpu.dot_dimension_numbers<[1], [0], [0], [1], [0, 0, 1, 1], [], []>} : vector<8x64xf32>, vector<64x640xf32>, vector<8x640xf32> -> vector<8x640xf32>
    %c0_9 = arith.constant 0 : index
    %c0_10 = arith.constant 0 : index
    %10 = vector.load %arg6[%c0_9, %c0_10] : memref<1x640xf32, #tpu.memory_space<vmem>>, vector<1x640xf32>
    %11 = vector.broadcast %10 : vector<1x640xf32> to vector<8x640xf32>
    %12 = arith.addf %9, %11 : vector<8x640xf32>
    %c0_11 = arith.constant 0 : index
    %c0_12 = arith.constant 0 : index
    %13 = vector.load %arg2[%c0_11, %c0_12] : memref<8x128xf32, #tpu.memory_space<vmem>>, vector<8x128xf32>
    %14 = vector.extract_strided_slice %12 {offsets = [0, 0], sizes = [8, 128], strides = [1, 1]} : vector<8x640xf32> to vector<8x128xf32>
    %15 = arith.mulf %13, %14 : vector<8x128xf32>
    %cst_13 = arith.constant dense<0.000000e+00> : vector<8xf32>
    %16 = vector.multi_reduction <add>, %15, %cst_13 [1] : vector<8x128xf32> to vector<8xf32>
    %17 = vector.shape_cast %16 : vector<8xf32> to vector<8x1xf32>
    %18 = vector.extract_strided_slice %13 {offsets = [0, 0], sizes = [8, 1], strides = [1, 1]} : vector<8x128xf32> to vector<8x1xf32>
    %19 = vector.extract_strided_slice %12 {offsets = [0, 128], sizes = [8, 128], strides = [1, 1]} : vector<8x640xf32> to vector<8x128xf32>
    %20 = vector.broadcast %18 : vector<8x1xf32> to vector<8x128xf32>
    %21 = arith.mulf %20, %19 : vector<8x128xf32>
    %22 = vector.extract_strided_slice %13 {offsets = [0, 1], sizes = [8, 1], strides = [1, 1]} : vector<8x128xf32> to vector<8x1xf32>
    %23 = vector.extract_strided_slice %12 {offsets = [0, 256], sizes = [8, 128], strides = [1, 1]} : vector<8x640xf32> to vector<8x128xf32>
    %24 = vector.broadcast %22 : vector<8x1xf32> to vector<8x128xf32>
    %25 = arith.mulf %24, %23 : vector<8x128xf32>
    %26 = arith.addf %21, %25 : vector<8x128xf32>
    %27 = vector.extract_strided_slice %13 {offsets = [0, 2], sizes = [8, 1], strides = [1, 1]} : vector<8x128xf32> to vector<8x1xf32>
    %28 = vector.extract_strided_slice %12 {offsets = [0, 384], sizes = [8, 128], strides = [1, 1]} : vector<8x640xf32> to vector<8x128xf32>
    %29 = vector.broadcast %27 : vector<8x1xf32> to vector<8x128xf32>
    %30 = arith.mulf %29, %28 : vector<8x128xf32>
    %31 = arith.addf %26, %30 : vector<8x128xf32>
    %32 = vector.extract_strided_slice %13 {offsets = [0, 3], sizes = [8, 1], strides = [1, 1]} : vector<8x128xf32> to vector<8x1xf32>
    %33 = vector.extract_strided_slice %12 {offsets = [0, 512], sizes = [8, 128], strides = [1, 1]} : vector<8x640xf32> to vector<8x128xf32>
    %34 = vector.broadcast %32 : vector<8x1xf32> to vector<8x128xf32>
    %35 = arith.mulf %34, %33 : vector<8x128xf32>
    %36 = arith.addf %31, %35 : vector<8x128xf32>
    %cst_14 = arith.constant dense<0.000000e+00> : vector<8xf32>
    %37 = vector.multi_reduction <add>, %36, %cst_14 [1] : vector<8x128xf32> to vector<8xf32>
    %38 = vector.shape_cast %37 : vector<8xf32> to vector<8x1xf32>
    %cst_15 = arith.constant 0.166666672 : f32
    %39 = vector.broadcast %cst_15 : f32 to vector<8x1xf32>
    %40 = arith.mulf %38, %39 : vector<8x1xf32>
    %41 = vector.broadcast %17 : vector<8x1xf32> to vector<8x128xf32>
    %42 = arith.addf %41, %36 : vector<8x128xf32>
    %43 = vector.broadcast %40 : vector<8x1xf32> to vector<8x128xf32>
    %44 = arith.subf %42, %43 : vector<8x128xf32>
    %c0_16 = arith.constant 0 : index
    %c0_17 = arith.constant 0 : index
    %45 = vector.load %arg7[%c0_16, %c0_17] : memref<8x128xf32, #tpu.memory_space<vmem>>, vector<8x128xf32>
    tpu.vector_store %arg7[%c0_16, %c0_17], %44 {strides = array<i32>} : memref<8x128xf32, #tpu.memory_space<vmem>>, vector<8x128xf32>,
    return
  }
  func.func @transform_0(%arg0: i32) -> (i32, i32) {
    %c0_i32 = arith.constant 0 : i32
    %c0_i32_0 = arith.constant 0 : i32
    return %arg0, %c0_i32 : i32, i32
  }
  func.func @transform_1(%arg0: i32) -> (i32, i32) {
    %c0_i32 = arith.constant 0 : i32
    %c0_i32_0 = arith.constant 0 : i32
    return %arg0, %c0_i32 : i32, i32
  }
  func.func @transform_2(%arg0: i32) -> (i32, i32) {
    %c0_i32 = arith.constant 0 : i32
    %c0_i32_0 = arith.constant 0 : i32
    %c0_i32_1 = arith.constant 0 : i32
    return %c0_i32, %c0_i32_0 : i32, i32
  }
  func.func @transform_3(%arg0: i32) -> (i32, i32) {
    %c0_i32 = arith.constant 0 : i32
    %c0_i32_0 = arith.constant 0 : i32
    %c0_i32_1 = arith.constant 0 : i32
    return %c0_i32, %c0_i32_0 : i32, i32
  }
  func.func @transform_4(%arg0: i32) -> (i32, i32) {
    %c0_i32 = arith.constant 0 : i32
    %c0_i32_0 = arith.constant 0 : i32
    %c0_i32_1 = arith.constant 0 : i32
    return %c0_i32, %c0_i32_0 : i32, i32
  }
  func.func @transform_5(%arg0: i32) -> (i32, i32) {
    %c0_i32 = arith.constant 0 : i32
    %c0_i32_0 = arith.constant 0 : i32
    %c0_i32_1 = arith.constant 0 : i32
    return %c0_i32, %c0_i32_0 : i32, i32
  }
  func.func @transform_6(%arg0: i32) -> (i32, i32) {
    %c0_i32 = arith.constant 0 : i32
    %c0_i32_0 = arith.constant 0 : i32
    return %arg0, %c0_i32 : i32, i32
  }
}

</mosaic_0001>

<bundles_post_ra>
// kernel: tpu_custom_call.1
= control target key start
LH: loop header
LB: loop body
LE: loop exit
PB: predicated region body
PF: predicated region fallthrough
CT: control target
= control target key end

     0   :  { %11 = vsyncpa [#allocation3], 0  ;;  %s873_s0 = inlined_call_operand.hbm [shape: f32[8,32], index: 0, kind: input, shape index: {}]   ;;  %s874_s1 = inlined_call_operand.hbm [shape: f32[8,128], index: 1, kind: input, shape index: {}]   ;;  %s875_s2 = inlined_call_operand.hbm [shape: f32[32,64], index: 2, kind: input, shape index: {}]   ;;  %s876_s3 = inlined_call_operand.vmem [shape: f32[1,64], index: 3, kind: input, shape index: {}]   ;;  %s877_s4 = inlined_call_operand.hbm [shape: f32[64,640], index: 4, kind: input, shape index: {}]   ;;  %s878_s5 = inlined_call_operand.vmem [shape: f32[1,640], index: 5, kind: input, shape index: {}]   ;;  %s879_s6 = inlined_call_operand.hbm [shape: f32[8,128], index: 6, kind: output, shape index: {}]  }
   0x1   :  { %12 = vsyncpa [#allocation6], 0 }
   0x2   :  { %13 = vsyncpa [#allocation9], 0 }
   0x3   :  { %14 = vsyncpa [#allocation4], 0  ;;  %s734_s21 = smov [#allocation5]   ;;  %s735_s23 = smov [#allocation2]  }
   0x4   :  { %s31_s22 = sshll.u32 %s734_s21, 4  ;;  %s21_s24 = sshll.u32 %s735_s23, 4  ;;  %s32_s22 = int_to_ptr.vmem [resolvable:$true] %s31_s22  ;;  %s22_s24 = int_to_ptr.vmem [resolvable:$true] %s21_s24 }
   0x5   :  { %s616_s27 = scalar_lea.hbm %s874_s1, 128 }
   0x6   :  { %p617_p0 = scmp.ne.s32.totalorder %s874_s1, %s616_s27  ;;  %p620_p1 = scmp.lt.u32.totalorder %s616_s27, %s874_s1 }
   0x8   :  { %p622_p2 = pnand %p620_p1, %p617_p0 }
   0xa   :  { %625 = shalt.err (!%p622_p2)
}
   0xb   :  { %s626_s8 = scalar_lea.vmem %s32_s22, 128  ;;  %p631_p4 = scmp.lt.s32.totalorder %s32_s22, %s32_s22 }
   0xc   :  { %p627_p3 = scmp.ne.s32.totalorder %s32_s22, %s626_s8  ;;  %p632_p5 = scmp.lt.s32.totalorder %s626_s8, %s626_s8 }
   0xe   :  { %p633_p6 = por %p632_p5, %p631_p4 }
  0x10   :  { %p634_p7 = pnand %p633_p6, %p627_p3 }
  0x12   :  { %637 = shalt.err (!%p634_p7)
}
  0x13   :  { %34 = dma.hbm_to_vmem [thread:$0]  %s874_s1, 128, %s32_s22, [#allocation6]  }
  0x14   :  { %s638_s13 = scalar_lea.hbm %s873_s0, 128 }
  0x15   :  { %p639_p8 = scmp.ne.s32.totalorder %s873_s0, %s638_s13  ;;  %p642_p9 = scmp.lt.u32.totalorder %s638_s13, %s873_s0 }
  0x17   :  { %p644_p10 = pnand %p642_p9, %p639_p8 }
  0x19   :  { %647 = shalt.err (!%p644_p10)
}
  0x1a   :  { %s648_s18 = scalar_lea.vmem %s22_s24, 128  ;;  %p653_p12 = scmp.lt.s32.totalorder %s22_s24, %s22_s24 }
  0x1b   :  { %p649_p11 = scmp.ne.s32.totalorder %s22_s24, %s648_s18  ;;  %p654_p13 = scmp.lt.s32.totalorder %s648_s18, %s648_s18 }
  0x1d   :  { %p655_p0 = por %p654_p13, %p653_p12 }
  0x1f   :  { %p656_p1 = pnand %p655_p0, %p649_p11 }
  0x21   :  { %659 = shalt.err (!%p656_p1)
}
  0x22   :  { %24 = dma.hbm_to_vmem [thread:$0]  %s873_s0, 128, %s22_s24, [#allocation3]  }
  0x23   :  { %s736_s20 = smov [#allocation7]   ;;  %s660_s25 = scalar_lea.hbm %s875_s2, 512 }
  0x24   :  { %s40_s21 = sshll.u32 %s736_s20, 4  ;;  %p661_p2 = scmp.ne.s32.totalorder %s875_s2, %s660_s25  ;;  %s41_s21 = int_to_ptr.vmem [resolvable:$true] %s40_s21 }
  0x25   :  { %p664_p3 = scmp.lt.u32.totalorder %s660_s25, %s875_s2 }
  0x27   :  { %p666_p4 = pnand %p664_p3, %p661_p2 }
  0x29   :  { %669 = shalt.err (!%p666_p4)
}
  0x2a   :  { %s670_s30 = scalar_lea.vmem %s41_s21, 512  ;;  %p675_p6 = scmp.lt.s32.totalorder %s41_s21, %s41_s21 }
  0x2b   :  { %p671_p5 = scmp.ne.s32.totalorder %s41_s21, %s670_s30  ;;  %p676_p7 = scmp.lt.s32.totalorder %s670_s30, %s670_s30 }
  0x2d   :  { %p677_p8 = por %p676_p7, %p675_p6 }
  0x2f   :  { %p678_p9 = pnand %p677_p8, %p671_p5 }
  0x31   :  { %681 = shalt.err (!%p678_p9)
}
  0x32   :  { %s737_s0 = smov 128   ;;  %s738_s24 = smov 8  }
  0x33   :  { %46 = dma.hbm_to_vmem [thread:$0]  %s875_s2, 512, %s41_s21, [#allocation6], %s737_s0, %s737_s0, %s738_s24  }
  0x34   :  { %s739_s9 = smov [#allocation8]   ;;  %s682_s13 = scalar_lea.hbm %s877_s4, 5120 }
  0x35   :  { %s54_s10 = sshll.u32 %s739_s9, 4  ;;  %p683_p10 = scmp.ne.s32.totalorder %s877_s4, %s682_s13  ;;  %s55_s10 = int_to_ptr.vmem [resolvable:$true] %s54_s10 }
  0x36   :  { %p686_p11 = scmp.lt.u32.totalorder %s682_s13, %s877_s4 }
  0x38   :  { %p688_p12 = pnand %p686_p11, %p683_p10 }
  0x3a   :  { %691 = shalt.err (!%p688_p12)
}
  0x3b   :  { %s692_s18 = scalar_lea.vmem %s55_s10, 5120  ;;  %p697_p0 = scmp.lt.s32.totalorder %s55_s10, %s55_s10 }
  0x3c   :  { %p693_p13 = scmp.ne.s32.totalorder %s55_s10, %s692_s18  ;;  %p698_p1 = scmp.lt.s32.totalorder %s692_s18, %s692_s18 }
  0x3e   :  { %p699_p2 = por %p698_p1, %p697_p0 }
  0x40   :  { %p700_p3 = pnand %p699_p2, %p693_p13 }
  0x42   :  { %703 = shalt.err (!%p700_p3)
}
  0x43   :  { %s740_s2 = smov 640   ;;  %s741_s1 = smov 40  }
  0x44   :  { %60 = dma.hbm_to_vmem [thread:$0]  %s877_s4, 5120, %s55_s10, [#allocation9], %s740_s2, %s740_s2, %s741_s1  }
  0x45   :  { %726 = dma.done.wait [#allocation3], 128  }
  0x46   :  { %727 = vsyncadd [#allocation3], 4294967168 }
  0x47   :  { %728 = dma.done.wait [#allocation6], 640  }
  0x48   :  { %729 = vsyncadd [#allocation6], 4294966656 }
  0x49   :  { %730 = dma.done.wait [#allocation9], 5120  }
  0x4a   :  { %731 = vsyncadd [#allocation9], 4294962176  ;;  %v742_v0 = vmov 0.0|0.0   ;;  %vm743_vm0 = vmmov 0   ;;  %v744_v1 = vmov 0.0   ;;  %v76_v2 = vld [vmem:[#allocation7] sm:$0xff] }
  0x4b   :  { %545 = vmatprep.subr.bf16.mxu0 %v742_v0  ;;  %523 = vmatprep.mubr.msk.f32.mxu0 %vm743_vm0, %v744_v1  ;;  %v77_v3 = vld [vmem:[#allocation7 + $0x8] sm:$0xff]  ;;  %v78_v4 = vld [vmem:[#allocation7 + $0x10] sm:$0xff]  ;;  %v79_v6 = vld [vmem:[#allocation7 + $0x18] sm:$0xff]  ;;  %vm87_vm1 = vcmask 261120   ;;  %v745_v58 = vmov 0   ;;  %v746_v59 = vmov 2  }
  0x4c   :  { %297 = vmatprep.mubr.f32.mxu1 %v744_v1  ;;  %v546_v5 = vpack.c.bf16 %v77_v3, %v76_v2  ;;  %v163_v7 = vld [vmem:[#allocation8 + $0x8] sm:$0xff]  ;;  %v168_v8 = vld [vmem:[#allocation8 + $0x30] sm:$0xff]  ;;  %v162_v9 = vld [vmem:[#allocation8] sm:$0xff]  ;;  %v549_v11 = vpack.c.bf16 %v79_v6, %v78_v4  ;;  %611 = vset.pattern.permute.xlu0 %v745_v58  ;;  %v747_v60 = vmov 1   ;;  %v748_v61 = vmov 3  }
  0x4d   :  { %v167_v10 = vld [vmem:[#allocation8 + $0x28] sm:$0xff]  ;;  %v551_v12 = vpack.c.bf16 %v168_v8, %v163_v7  ;;  %v165_v14 = vld [vmem:[#allocation8 + $0x18] sm:$0xff]  ;;  %v170_v15 = vld [vmem:[#allocation8 + $0x40] sm:$0xff]  ;;  %613 = vset.pattern.permute.xlu1 %v746_v59  ;;  %vm229_vm2 = vcmask 523264  }
  0x4e   :  { %547 = vmatpush3.bf16.msra.mxu0 %v546_v5  ;;  %v553_v13 = vpack.c.bf16 %v167_v10, %v162_v9  ;;  %v164_v16 = vld [vmem:[#allocation8 + $0x10] sm:$0xff]  ;;  %v567_v17 = vpack.c.bf16 %v170_v15, %v165_v14  ;;  %v169_v18 = vld [vmem:[#allocation8 + $0x38] sm:$0xff]  ;;  %v178_v20 = vld [vmem:[#allocation8 + $0x80] sm:$0xff] }
  0x4f   :  { %548 = vmatprep.subr.bf16.mxu0 %v742_v0  ;;  %v173_v19 = vld [vmem:[#allocation8 + $0x58] sm:$0xff]  ;;  %552 = vmatprep.subr.bf16.mxu1 %v551_v12  ;;  %v172_v22 = vld [vmem:[#allocation8 + $0x50] sm:$0xff]  ;;  %v175_v24 = vld [vmem:[#allocation8 + $0x68] sm:$0xff]  ;;  %v569_v28 = vpack.c.bf16 %v169_v18, %v164_v16 }
  0x50   :  { %v555_v21 = vpack.c.bf16 %v178_v20, %v173_v19  ;;  %v177_v23 = vld [vmem:[#allocation8 + $0x78] sm:$0xff]  ;;  %v75_v25 = vld [vmem:[#allocation2] sm:$0xff]  ;;  %554 = vmatpush1.bf16.msra.mxu1 %v553_v13  ;;  %v183_v29 = vld [vmem:[#allocation8 + $0xa8] sm:$0xff] }
  0x51   :  { %v557_v26 = vpack.c.bf16 %v177_v23, %v172_v22  ;;  %v180_v27 = vld [vmem:[#allocation8 + $0x90] sm:$0xff]  ;;  %v182_v31 = vld [vmem:[#allocation8 + $0xa0] sm:$0xff]  ;;  %v179_v34 = vld [vmem:[#allocation8 + $0x88] sm:$0xff] }
  0x52   :  { %550 = vmatpush3.bf16.msra.mxu0 %v549_v11  ;;  %556 = vmatprep.subr.bf16.mxu1 %v555_v21  ;;  %v188_v30 = vld [vmem:[#allocation8 + $0xd0] sm:$0xff]  ;;  %v571_v32 = vpack.c.bf16 %v180_v27, %v175_v24  ;;  %v174_v33 = vld [vmem:[#allocation8 + $0x60] sm:$0xff]  ;;  %v187_v36 = vld [vmem:[#allocation8 + $0xc8] sm:$0xff] }
  0x53   :  { %568 = vmatprep.subr.bf16.mxu0 %v567_v17  ;;  %v559_v35 = vpack.c.bf16 %v188_v30, %v183_v29  ;;  %v185_v37 = vld [vmem:[#allocation8 + $0xb8] sm:$0xff]  ;;  %v190_v38 = vld [vmem:[#allocation8 + $0xe0] sm:$0xff]  ;;  %v561_v39 = vpack.c.bf16 %v187_v36, %v182_v31  ;;  %v573_v40 = vpack.c.bf16 %v179_v34, %v174_v33  ;;  %v184_v42 = vld [vmem:[#allocation8 + $0xb0] sm:$0xff]  ;;  %v204_v17 = vlaneseq }
  0x54   :  { %558 = vmatpush1.bf16.msra.mxu1 %v557_v26  ;;  %v575_v41 = vpack.c.bf16 %v190_v38, %v185_v37  ;;  %v189_v43 = vld [vmem:[#allocation8 + $0xd8] sm:$0xff]  ;;  %v198_v46 = vld [vmem:[#allocation8 + $0x120] sm:$0xff]  ;;  %v192_v48 = vld [vmem:[#allocation8 + $0xf0] sm:$0xff] }
  0x55   :  { %524 = vmatmul.mubr.msk.f32.vlgmr.msra.gmra.mrb[0].mxu0 %vm87_vm1, %v75_v25  ;;  %560 = vmatprep.subr.bf16.mxu1 %v559_v35  ;;  %v577_v44 = vpack.c.bf16 %v189_v43, %v184_v42  ;;  %v193_v45 = vld [vmem:[#allocation8 + $0xf8] sm:$0xff]  ;;  %v195_v50 = vld [vmem:[#allocation8 + $0x108] sm:$0xff]  ;;  %v200_v52 = vld [vmem:[#allocation8 + $0x130] sm:$0xff]  ;;  %v205_v18 = vshrl.u32 %v204_v17, 7 }
  0x56   :  { %570 = vmatpush1.bf16.msra.mxu0 %v569_v28  ;;  %368 = vmatprep.mubr.f32.mxu0 %v744_v1  ;;  %v563_v47 = vpack.c.bf16 %v198_v46, %v193_v45  ;;  %v197_v49 = vld [vmem:[#allocation8 + $0x118] sm:$0xff]  ;;  %v194_v53 = vld [vmem:[#allocation8 + $0x100] sm:$0xff]  ;;  %v199_v54 = vld [vmem:[#allocation8 + $0x128] sm:$0xff]  ;;  %v579_v55 = vpack.c.bf16 %v200_v52, %v195_v50 }
  0x57   :  { %572 = vmatprep.subr.bf16.mxu0 %v571_v32  ;;  %v565_v51 = vpack.c.bf16 %v197_v49, %v192_v48  ;;  %v581_v56 = vpack.c.bf16 %v199_v54, %v194_v53  ;;  %v840_v57 = vld [vmem:[#allocation5] sm:$0xff]  ;;  %v496_v62 = vld [vmem:[%s876_s3] ss:$0 sm:$0xff]  ;;  %v166_v63 = vld [vmem:[#allocation8 + $0x20] sm:$0xff]  ;;  %v206_v19 = vsub.s32 0, %v205_v18  ;;  %v214_v20 = vsub.s32 2, %v205_v18 }
  0x58   :  { %562 = vmatpush1.bf16.msra.mxu1 %v561_v39  ;;  %451 = vperm.xlu0 %611, %v840_v57   ;;  %v171_v2 = vld [vmem:[#allocation8 + $0x48] sm:$0xff]  ;;  %v176_v8 = vld [vmem:[#allocation8 + $0x70] sm:$0xff]  ;;  %v181_v9 = vld [vmem:[#allocation8 + $0x98] sm:$0xff]  ;;  %v210_v22 = vsub.s32 1, %v205_v18  ;;  %v218_v23 = vsub.s32 3, %v205_v18  ;;  %v222_v43 = vsub.s32 4, %v205_v18 }
  0x59   :  { %564 = vmatprep.subr.bf16.mxu1 %v563_v47  ;;  %462 = vperm.xlu1 %613, %v840_v57   ;;  %v584_v6 = vpack.c.bf16 %v171_v2, %v166_v63  ;;  %v587_v10 = vpack.c.bf16 %v181_v9, %v176_v8  ;;  %v186_v11 = vld [vmem:[#allocation8 + $0xc0] sm:$0xff]  ;;  %v191_v12 = vld [vmem:[#allocation8 + $0xe8] sm:$0xff]  ;;  %v196_v14 = vld [vmem:[#allocation8 + $0x110] sm:$0xff] }
  0x5a   :  { %574 = vmatpush1.bf16.msra.mxu0 %v573_v40  ;;  %v590_v13 = vpack.c.bf16 %v191_v12, %v186_v11  ;;  %v201_v15 = vld [vmem:[#allocation8 + $0x138] sm:$0xff]  ;;  %v202_v21 = vld [vmem:[%s878_s5] sm:$0x1f]  ;;  %s749_s5 = smov [#allocation10]  }
  0x5b   :  { %576 = vmatprep.subr.bf16.mxu0 %v575_v41  ;;  %v593_v16 = vpack.c.bf16 %v201_v15, %v196_v14  ;;  %v207_v24 = vrot.slane %v202_v21, %v206_v19  ;;  %v215_v25 = vrot.slane %v202_v21, %v214_v20  ;;  %v211_v26 = vrot.slane %v202_v21, %v210_v22  ;;  %s485_s23 = sshll.u32 %s749_s5, 4  ;;  %s486_s23 = int_to_ptr.vmem [resolvable:$true] %s485_s23 }
  0x5c   :  { %566 = vmatpush1.bf16.msra.mxu1 %v565_v51  ;;  %612 = vset.pattern.permute.xlu0 %v747_v60  ;;  %v219_v27 = vrot.slane %v202_v21, %v218_v23  ;;  %s704_s25 = scalar_lea.vmem %s486_s23, 128  ;;  %p709_p5 = scmp.lt.s32.totalorder %s486_s23, %s486_s23 }
  0x5d   :  { %583 = vmatprep.subr.bf16.mxu1 %v742_v0  ;;  %614 = vset.pattern.permute.xlu1 %v748_v61  ;;  %p705_p4 = scmp.ne.s32.totalorder %s486_s23, %s704_s25  ;;  %p710_p6 = scmp.lt.s32.totalorder %s704_s25, %s704_s25 }
  0x5e   :  { %578 = vmatpush1.bf16.msra.mxu0 %v577_v44  ;;  %456 = vperm.xlu0 %612, %v840_v57   ;;  %v223_v44 = vrot.slane %v202_v21, %v222_v43 }
  0x5f   :  { %580 = vmatprep.subr.bf16.mxu0 %v579_v55  ;;  %468 = vperm.xlu1 %614, %v840_v57   ;;  %p711_p7 = por %p710_p6, %p709_p5 }
  0x61   :  { %p712_p8 = pnand %p711_p7, %p705_p4 }
  0x62   :  { %582 = vmatpush1.bf16.msra.mxu0 %v581_v56  ;;  %615 = vset.pattern.permute.xlu0 %v748_v61 }
  0xd8   :  { %v463_v37 = vpop.permute.xlu1 %462 }
  0xde   :  { %v469_v46 = vpop.permute.xlu1 %468 }
 0x128   :  { %v157_v3 = vpop.f32.mrb[0].mxu0 }
 0x129   :  { %v158_v4 = vadd.f32 %v496_v62, %v157_v3  ;;  %v525_v5 = vpop.f32.mrb[1].mxu0 }
 0x12b   :  { %v161_v7 = vmax.f32 %v158_v4, 0.0 }
 0x12d   :  { %498 = vmatmul.mubr.msk.f32.vlgmr.msra.gmra.mrb[0].mxu1 %vm229_vm2, %v161_v7  ;;  %499 = vmatmul.mubr.msk.f32.vlgmr.msra.gmra.mrb[2].mxu0 %vm229_vm2, %v161_v7 }
 0x12e   :  { %585 = vmatpush3.bf16.msra.mxu1 %v584_v6  ;;  %542 = vmatprep.mubr.msk.f32.mxu1 %vm743_vm0, %v744_v1  ;;  %v452_v1 = vpop.permute.xlu0 %451 }
 0x12f   :  { %586 = vmatprep.subr.bf16.mxu1 %v742_v0 }
 0x132   :  { %588 = vmatpush3.bf16.msra.mxu1 %v587_v10  ;;  %v457_v28 = vpop.permute.xlu0 %456 }
 0x133   :  { %589 = vmatprep.subr.bf16.mxu1 %v742_v0 }
 0x136   :  { %591 = vmatpush3.bf16.msra.mxu1 %v590_v13 }
 0x137   :  { %592 = vmatprep.subr.bf16.mxu1 %v742_v0 }
 0x13a   :  { %594 = vmatpush3.bf16.msra.mxu1 %v593_v16 }
 0x13d   :  { %543 = vmatmul.mubr.msk.f32.vlgmr.msra.gmra.mrb[2].mxu1 %vm229_vm2, %v161_v7 }
 0x200   :  { %v299_v0 = vpop.f32.mrb[0].mxu1  ;;  %v370_v29 = vpop.f32.mrb[2].mxu0 }
 0x201   :  { %v300_v30 = vadd.f32 %v299_v0, %v207_v24  ;;  %v371_v31 = vadd.f32 %v370_v29, %v215_v25  ;;  %v301_v32 = vpop.f32.mrb[1].mxu1  ;;  %v372_v33 = vpop.f32.mrb[3].mxu0 }
 0x202   :  { %v302_v34 = vadd.f32 %v301_v32, %v211_v26  ;;  %v373_v35 = vadd.f32 %v372_v33, %v219_v27 }
 0x203   :  { %v459_v36 = vmul.f32 %v457_v28, %v371_v31  ;;  %v446_v38 = vmul.f32 %v840_v57, %v300_v30 }
 0x204   :  { %v454_v39 = vmul.f32 %v452_v1, %v302_v34  ;;  %v465_v41 = vmul.f32 %v463_v37, %v373_v35 }
 0x205   :  { %447 = vadd.xlane.f32.xlu1 %v446_v38 }
 0x206   :  { %v460_v40 = vadd.f32 %v459_v36, %v454_v39 }
 0x208   :  { %v466_v42 = vadd.f32 %v465_v41, %v460_v40 }
 0x210   :  { %v441_v45 = vpop.f32.mrb[2].mxu1 }
 0x211   :  { %v442_v47 = vadd.f32 %v441_v45, %v223_v44  ;;  %v544_v48 = vpop.f32.mrb[3].mxu1 }
 0x213   :  { %v471_v49 = vmul.f32 %v469_v46, %v442_v47 }
 0x215   :  { %v472_v50 = vadd.f32 %v471_v49, %v466_v42 }
 0x217   :  { %473 = vadd.xlane.f32.xlu0 %v472_v50 }
 0x292   :  { %v448_v51 = vpop.xlane.xlu1 %447 }
 0x293   :  { %v476_v53 = vadd.f32 %v472_v50, %v448_v51 }
 0x2a4   :  { %v474_v52 = vpop.xlane.xlu0 %473 }
 0x2a5   :  { %v475_v54 = vmul.f32 0.16666667, %v474_v52 }
 0x2a7   :  { %v477_v55 = vsub.f32 %v476_v53, %v475_v54 }
 0x2a9   :  { %478 = vst [vmem:[#allocation10] sm:$0xff] %v477_v55 }
 0x2aa   :  { %715 = shalt.err (!%p712_p8)
}
 0x2ab   :  { %s716_s28 = scalar_lea.hbm %s879_s6, 128 }
 0x2ac   :  { %p717_p9 = scmp.ne.s32.totalorder %s879_s6, %s716_s28  ;;  %p720_p10 = scmp.lt.u32.totalorder %s716_s28, %s879_s6 }
 0x2ae   :  { %p722_p11 = pnand %p720_p10, %p717_p9 }
 0x2b0   :  { %725 = shalt.err (!%p722_p11)
}
 0x2b1   :  { %488 = dma.vmem_to_hbm [thread:$0]  %s486_s23, 128, %s879_s6, [#allocation4]  }
 0x2b2   :  { %732 = dma.done.wait [#allocation4], 128  }
 0x2b3   :  { %733 = vsyncadd [#allocation4], 4294967168 }
 0x2b4   :  { %492 = vsyncpa [#allocation3], 1 }
 0x2b5   :  { %493 = vsyncpa [#allocation6], 1 }
 0x2b6   :  { %494 = vsyncpa [#allocation9], 1 }
 0x2b7   :  { %495 = vsyncpa [#allocation4], 1 }

</bundles_post_ra>
